<compile_context>
chip_gen: v7x
topology: tpu7x:2x2x1
jax: 0.10.0
libtpu: 0.0.40
codegen_flags: <defaults>
</compile_context>

<pallas_src>
import jax
import jax.numpy as jnp
from jax.experimental import pallas as pl
from jax.experimental.pallas import tpu as pltpu

ENC_DIM = 128       # encoder embedding dim (already lane-dense)
NUM_CLASSES = 8
SEQ_LEN = 17        # 16 patches + [class] token (ViT context)
BATCH = 2
LANE = 128          # TPU lane tile (last dim)
SUBLANE = 8         # f32 sublane tile (second-to-last dim)


# --------------------------------------------------------------------------
# Kernel: one MXU matmul (bf16 operands, f32 accumulation) + f32 bias add.
#   cls_ref: (Bp, D) bf16   w_ref: (D, Np) bf16   b_ref: (1, Np) f32
#   o_ref:   (Bp, Np) f32
# --------------------------------------------------------------------------
def _head_kernel(cls_ref, w_ref, b_ref, o_ref):
    o_ref[...] = (
        jnp.dot(cls_ref[...], w_ref[...], preferred_element_type=jnp.float32)
        + b_ref[...]
    )


def prepare_head_params(weight, bias, *, n_pad=LANE, compute_dtype=jnp.bfloat16):
    """One-time repack of the nn.Linear parameters (call OUTSIDE the hot path).

    weight: (num_classes, enc_dim) -> (enc_dim, n_pad) compute_dtype, zero-padded.
    bias:   (num_classes,)         -> (1, n_pad) float32, zero-padded.
    """
    n_cls, d = weight.shape
    assert n_pad % LANE == 0 and n_pad >= n_cls
    w_pad = jnp.zeros((d, n_pad), compute_dtype).at[:, :n_cls].set(
        weight.T.astype(compute_dtype))
    b_pad = jnp.zeros((1, n_pad), jnp.float32).at[:, :n_cls].set(
        bias.astype(jnp.float32)[None, :])
    return w_pad, b_pad


@jax.jit
def vit_classifier_head(x, w_pad, b_pad):
    """ViT classification head.

    Args:
      x:     (B, S, D) transformer-encoder output (float32).
      w_pad: (D, n_pad) pre-transposed, lane-padded weight (bf16).
      b_pad: (1, n_pad) lane-padded bias (f32).
    Returns:
      (B, NUM_CLASSES) float32 logits.
    """
    B, S, D = x.shape
    n_pad = w_pad.shape[1]
    b_sub = max(SUBLANE, -(-B // SUBLANE) * SUBLANE)

    # Class-token select + sublane pad + bf16 cast: one tiny fused XLA op.
    cls = jax.lax.slice_in_dim(x, 0, 1, axis=1).reshape(B, D)
    cls_p = jnp.zeros((b_sub, D), w_pad.dtype).at[:B, :].set(
        cls.astype(w_pad.dtype))

    logits_padded = pl.pallas_call(
        _head_kernel,
        out_shape=jax.ShapeDtypeStruct((b_sub, n_pad), jnp.float32),
        in_specs=[
            pl.BlockSpec(memory_space=pltpu.MemorySpace.VMEM),
            pl.BlockSpec(memory_space=pltpu.MemorySpace.VMEM),
            pl.BlockSpec(memory_space=pltpu.MemorySpace.VMEM),
        ],
        out_specs=pl.BlockSpec(memory_space=pltpu.MemorySpace.VMEM),
    )(cls_p, w_pad, b_pad)

    return logits_padded[:B, :NUM_CLASSES]


if __name__ == "__main__":
    key = jax.random.PRNGKey(0)
    k_x, k_w, k_b = jax.random.split(key, 3)

    x = jax.random.normal(k_x, (BATCH, SEQ_LEN, ENC_DIM), jnp.float32)
    bound = 1.0 / (ENC_DIM ** 0.5)                        # nn.Linear-style init
    weight = jax.random.uniform(k_w, (NUM_CLASSES, ENC_DIM), jnp.float32,
                                -bound, bound)
    bias = jax.random.uniform(k_b, (NUM_CLASSES,), jnp.float32, -bound, bound)

    # One-time parameter repack (hoisted out of the per-call path).
    w_pad, b_pad = prepare_head_params(weight, bias)

    logits = jax.block_until_ready(vit_classifier_head(x, w_pad, b_pad))

    # Pure-JAX references mirroring the PyTorch module's forward.
    ref_f32 = x[:, 0, :] @ weight.T + bias[None, :]
    # Reference matching the kernel's bf16-operand / f32-accumulate path.
    ref_bf16 = (x[:, 0, :].astype(jnp.bfloat16).astype(jnp.float32)
                @ weight.T.astype(jnp.bfloat16).astype(jnp.float32)
                + bias[None, :])

    assert logits.shape == (BATCH, NUM_CLASSES)
    assert bool(jnp.all(jnp.isfinite(logits)))
    assert bool(jnp.allclose(logits, ref_bf16, atol=1e-3, rtol=1e-3))
    assert bool(jnp.allclose(logits, ref_f32, atol=5e-2, rtol=0.0))
    print("KERNEL_OK")
</pallas_src>

<mosaic_0001>
module attributes {stable_mosaic.version = 11 : i64} {
  func.func @_head_kernel(%arg0: memref<8x128xbf16, #tpu.memory_space<vmem>>, %arg1: memref<128x128xbf16, #tpu.memory_space<vmem>>, %arg2: memref<1x128xf32, #tpu.memory_space<vmem>>, %arg3: memref<8x128xf32, #tpu.memory_space<vmem>>) attributes {dimension_semantics = [], scalar_prefetch = 0 : i64, scratch_operands = 0 : i64, tpu.core_type = #tpu.core_type<tc>} {
    %c0 = arith.constant 0 : index
    %c0_0 = arith.constant 0 : index
    %0 = vector.load %arg0[%c0, %c0_0] : memref<8x128xbf16, #tpu.memory_space<vmem>>, vector<8x128xbf16>
    %c0_1 = arith.constant 0 : index
    %c0_2 = arith.constant 0 : index
    %1 = vector.load %arg1[%c0_1, %c0_2] : memref<128x128xbf16, #tpu.memory_space<vmem>>, vector<128x128xbf16>
    %cst = arith.constant dense<0.000000e+00> : vector<8x128xf32>
    %2 = tpu.matmul %0, %1, %cst {dimension_numbers = #tpu.dot_dimension_numbers<[1], [0], [0], [1], [0, 0, 1, 1], [], []>} : vector<8x128xbf16>, vector<128x128xbf16>, vector<8x128xf32> -> vector<8x128xf32>
    %c0_3 = arith.constant 0 : index
    %c0_4 = arith.constant 0 : index
    %3 = vector.load %arg2[%c0_3, %c0_4] : memref<1x128xf32, #tpu.memory_space<vmem>>, vector<1x128xf32>
    %4 = vector.broadcast %3 : vector<1x128xf32> to vector<8x128xf32>
    %5 = arith.addf %2, %4 : vector<8x128xf32>
    %c0_5 = arith.constant 0 : index
    %c0_6 = arith.constant 0 : index
    %6 = vector.load %arg3[%c0_5, %c0_6] : memref<8x128xf32, #tpu.memory_space<vmem>>, vector<8x128xf32>
    tpu.vector_store %arg3[%c0_5, %c0_6], %5 {strides = array<i32>} : memref<8x128xf32, #tpu.memory_space<vmem>>, vector<8x128xf32>,
    return
  }
}

</mosaic_0001>

<bundles_post_ra>
// kernel: vit_classifier_head.1
= control target key start
LH: loop header
LB: loop body
LE: loop exit
PB: predicated region body
PF: predicated region fallthrough
CT: control target
= control target key end

     0   :  { %8 = vsyncpa [#allocation3], 0  ;;  %s222_s12 = smov [#allocation2]   ;;  %s268_s0 = inlined_call_operand.vmem [shape: bf16[8,128], index: 0, kind: input, shape index: {}]   ;;  %s269_s1 = inlined_call_operand.hbm [shape: bf16[128,128], index: 1, kind: input, shape index: {}]   ;;  %s270_s2 = inlined_call_operand.vmem [shape: f32[1,128], index: 2, kind: input, shape index: {}]   ;;  %s271_s3 = inlined_call_operand.vmem [shape: f32[8,128], index: 3, kind: output, shape index: {}]  }
   0x1   :  { %s16_s13 = sshll.u32 %s222_s12, 4  ;;  %s198_s16 = scalar_lea.hbm %s269_s1, 1024  ;;  %s17_s13 = int_to_ptr.vmem [resolvable:$true] %s16_s13 }
   0x2   :  { %p199_p0 = scmp.ne.s32.totalorder %s269_s1, %s198_s16  ;;  %p202_p1 = scmp.lt.u32.totalorder %s198_s16, %s269_s1 }
   0x4   :  { %p204_p2 = pnand %p202_p1, %p199_p0 }
   0x6   :  { %207 = shalt.err (!%p204_p2)
}
   0x7   :  { %s208_s21 = scalar_lea.vmem %s17_s13, 1024  ;;  %p213_p4 = scmp.lt.s32.totalorder %s17_s13, %s17_s13 }
   0x8   :  { %p209_p3 = scmp.ne.s32.totalorder %s17_s13, %s208_s21  ;;  %p214_p5 = scmp.lt.s32.totalorder %s208_s21, %s208_s21 }
   0xa   :  { %p215_p6 = por %p214_p5, %p213_p4 }
   0xc   :  { %p216_p7 = pnand %p215_p6, %p209_p3 }
   0xe   :  { %219 = shalt.err (!%p216_p7)
}
   0xf   :  { %s223_s22 = smov 64   ;;  %s224_s23 = smov 4  }
  0x10   :  { %22 = dma.hbm_to_vmem [thread:$0]  %s269_s1, 1024, %s17_s13, [#allocation3], %s223_s22, %s223_s22, %s224_s23  }
  0x11   :  { %220 = dma.done.wait [#allocation3], 1024  }
  0x12   :  { %221 = vsyncadd [#allocation3], 4294966272  ;;  %v225_v0 = vmov 0.0   ;;  %vm226_vm0 = vmmov 0   ;;  %v190_v1 = vld [vmem:[#allocation2] sm:$0xff]   ;;  %v191_v2 = vld [vmem:[#allocation2 + $0x8] sm:$0xff]  }
  0x13   :  { %165 = vmatprep.subr.bf16.mxu0 %v225_v0  ;;  %181 = vmatprep.mubr.msk.bf16.mxu0 %vm226_vm0, %v225_v0  ;;  %v192_v3 = vld [vmem:[#allocation2 + $0x10] sm:$0xff]   ;;  %v193_v4 = vld [vmem:[#allocation2 + $0x18] sm:$0xff]   ;;  %v194_v5 = vld [vmem:[#allocation2 + $0x20] sm:$0xff]  }
  0x14   :  { %166 = vmatpush3.bf16.msra.mxu0 %v190_v1  ;;  %v195_v6 = vld [vmem:[#allocation2 + $0x28] sm:$0xff]   ;;  %v196_v7 = vld [vmem:[#allocation2 + $0x30] sm:$0xff]   ;;  %v197_v8 = vld [vmem:[#allocation2 + $0x38] sm:$0xff]  }
  0x15   :  { %167 = vmatprep.subr.bf16.mxu0 %v225_v0  ;;  %v29_v9 = vld [vmem:[%s268_s0] sm:$0xf] }
  0x16   :  { %v147_v10 = vld [vmem:[%s270_s2] ss:$0 sm:$0xff] }
  0x18   :  { %168 = vmatpush3.bf16.msra.mxu0 %v191_v2 }
  0x19   :  { %169 = vmatprep.subr.bf16.mxu0 %v225_v0 }
  0x1c   :  { %170 = vmatpush3.bf16.msra.mxu0 %v192_v3 }
  0x1d   :  { %171 = vmatprep.subr.bf16.mxu0 %v225_v0 }
  0x20   :  { %172 = vmatpush3.bf16.msra.mxu0 %v193_v4 }
  0x21   :  { %173 = vmatprep.subr.bf16.mxu0 %v225_v0 }
  0x24   :  { %174 = vmatpush3.bf16.msra.mxu0 %v194_v5 }
  0x25   :  { %175 = vmatprep.subr.bf16.mxu0 %v225_v0 }
  0x28   :  { %176 = vmatpush3.bf16.msra.mxu0 %v195_v6 }
  0x29   :  { %177 = vmatprep.subr.bf16.mxu0 %v225_v0 }
  0x2c   :  { %178 = vmatpush3.bf16.msra.mxu0 %v196_v7 }
  0x2d   :  { %179 = vmatprep.subr.bf16.mxu0 %v225_v0 }
  0x30   :  { %180 = vmatpush3.bf16.msra.mxu0 %v197_v8 }
  0x33   :  { %182 = vmatmul.mubr.bf16.vlgmr.msra.gmra.mrb[0].mxu0 %v29_v9 }
 0x106   :  { %v135_v11 = vpop.f32.mrb[0].mxu0 }
 0x107   :  { %v136_v12 = vadd.f32 %v147_v10, %v135_v11  ;;  %v183_v13 = vpop.f32.mrb[1].mxu0 }
 0x108   :  { %v138_v14 = vpop.f32.mrb[2].mxu0 }
 0x109   :  { %141 = vst [vmem:[%s271_s3] sm:$0xff] %v136_v12  ;;  %v184_v15 = vpop.f32.mrb[3].mxu0 }
 0x10a   :  { %146 = vsyncpa [#allocation3], 1 }

</bundles_post_ra>
